<compile_context>
chip_gen: v5e
topology: v5e:2x2
jax: 0.10.0
libtpu: 0.0.40
codegen_flags: <defaults>
</compile_context>

<pallas_src>
import jax
import jax.numpy as jnp
import numpy as np
from jax.experimental import pallas as pl
from jax.experimental.pallas import tpu as pltpu


# ----------------------------------------------------------------------------
# Kernel 1: zdes = (x + y) @ P_des + b_des
#   x, y tiles : (TM, HW)   P_des : (HW, 128) bf16 resident   out : (TM, 128) bf16
# ----------------------------------------------------------------------------
def pool_des_kernel(x_ref, y_ref, pdes_ref, bdes_ref, zdes_ref):
    u = (x_ref[...] + y_ref[...]).astype(pdes_ref.dtype)          # bf16 for MXU
    acc = jnp.dot(u, pdes_ref[...], preferred_element_type=jnp.float32)
    zdes_ref[...] = (acc + bdes_ref[...]).astype(zdes_ref.dtype)


# ----------------------------------------------------------------------------
# Kernel 2: fc (Linear + folded eval-BN) -> ReLU -> fc_x / fc_y ->
#           2-way branch softmax, emitted as w_x = sigmoid(z_x - z_y).
#           Tiny (a few KB), single block.
# ----------------------------------------------------------------------------
def fc_act_kernel(z_ref, wfc_ref, bfc_ref, wfx_ref, bfx_ref, wfy_ref, bfy_ref,
                  wx_ref):
    z = z_ref[...].astype(jnp.float32)                                  # (B, C*128)
    zf = jnp.maximum(
        jnp.dot(z, wfc_ref[...], preferred_element_type=jnp.float32)
        + bfc_ref[...],
        0.0,
    )                                                                   # (B, d)
    zx = jnp.dot(zf, wfx_ref[...],
                 preferred_element_type=jnp.float32) + bfx_ref[...]     # (B, C)
    zy = jnp.dot(zf, wfy_ref[...],
                 preferred_element_type=jnp.float32) + bfy_ref[...]     # (B, C)
    # softmax over the 2 branches == sigmoid of the logit difference
    wx_ref[...] = 1.0 / (1.0 + jnp.exp(zy - zx))


# ----------------------------------------------------------------------------
# Kernel 3: out = x * w_x + y * (1 - w_x) = y + w_x * (x - y)
#   x, y, out tiles : (TM, HW)   w_x tile : (TM, 1)
# ----------------------------------------------------------------------------
def apply_kernel(x_ref, y_ref, wx_ref, o_ref):
    xf = x_ref[...].astype(jnp.float32)
    yf = y_ref[...].astype(jnp.float32)
    o_ref[...] = (yf + wx_ref[...] * (xf - yf)).astype(o_ref.dtype)


# ----------------------------------------------------------------------------
# Parameter setup / init-time folding
# ----------------------------------------------------------------------------
def build_pool_matrix(H, W, ppl):
    """P[h*W + w, f] = 1/region_size if pixel (h,w) lies in pyramid cell f.

    Matches torch.cat of F.adaptive_avg_pool2d(U, 2**s).view(B, C, 1, -1) for
    s = 0 .. ppl-1 (row-major cell flattening), using PyTorch's floor/ceil
    region boundaries so non-divisible H/W are handled exactly."""
    F = (4 ** ppl - 1) // 3
    P = np.zeros((H * W, F), dtype=np.float32)
    off = 0
    for s in range(ppl):
        k = 2 ** s
        for i in range(k):
            h0 = (i * H) // k
            h1 = -((-(i + 1) * H) // k)          # ceil((i+1)*H / k)
            for j in range(k):
                w0 = (j * W) // k
                w1 = -((-(j + 1) * W) // k)
                area = (h1 - h0) * (w1 - w0)
                for h in range(h0, h1):
                    for w in range(w0, w1):
                        P[h * W + w, off + i * k + j] = 1.0 / area
        off += k * k
    return P


def init_params(key, C, H, W, dd=8, r=32, ppl=4):
    F = (4 ** ppl - 1) // 3
    D = min(dd, F)
    d = max(int(C / r), 16)
    ks = jax.random.split(key, 8)
    return {
        "pool": jnp.asarray(build_pool_matrix(H, W, ppl)),
        "w_des": jax.random.normal(ks[0], (D, F), jnp.float32) * 0.1,
        "b_des": jax.random.normal(ks[1], (D,), jnp.float32) * 0.1,
        "w_fc": jax.random.normal(ks[2], (d, C * D), jnp.float32) * 0.1,
        # BatchNorm1d (eval mode): PyTorch default init
        "bn_gamma": jnp.ones((d,), jnp.float32),
        "bn_beta": jnp.zeros((d,), jnp.float32),
        "bn_mean": jnp.zeros((d,), jnp.float32),
        "bn_var": jnp.ones((d,), jnp.float32),
        "w_fx": jax.random.normal(ks[3], (C, d), jnp.float32) * 0.1,
        "b_fx": jax.random.normal(ks[4], (C,), jnp.float32) * 0.1,
        "w_fy": jax.random.normal(ks[5], (C, d), jnp.float32) * 0.1,
        "b_fy": jax.random.normal(ks[6], (C,), jnp.float32) * 0.1,
    }


def _round_up(v, m):
    return ((v + m - 1) // m) * m


def fold_params(params, H, W):
    """Init-time algebra:
      * pool pyramid @ descriptor conv folded into a single bf16 (HW,128) matrix
      * eval-mode BatchNorm1d folded into the bias-free fc Linear
      * fc weight zero-scattered to the 128-lane zdes layout so no XLA slice of
        zdes is ever needed at runtime."""
    P = np.asarray(params["pool"], np.float32)        # (HW, F)
    w_des = np.asarray(params["w_des"], np.float32)   # (D, F)
    b_des = np.asarray(params["b_des"], np.float32)   # (D,)
    D = w_des.shape[0]
    HW = H * W
    d_pad = max(128, _round_up(D, 128))               # lane-dense descriptor out

    p_des = P @ w_des.T                               # (HW, D)
    p_des_pad = np.zeros((HW, d_pad), np.float32)
    p_des_pad[:, :D] = p_des
    b_des_pad = np.zeros((1, d_pad), np.float32)
    b_des_pad[0, :D] = b_des

    # Fold eval-mode BatchNorm1d into the bias-free fc Linear.
    gamma = np.asarray(params["bn_gamma"], np.float32)
    beta = np.asarray(params["bn_beta"], np.float32)
    mean = np.asarray(params["bn_mean"], np.float32)
    var = np.asarray(params["bn_var"], np.float32)
    scale = gamma / np.sqrt(var + 1e-5)
    w_fc = np.asarray(params["w_fc"], np.float32)     # (d, C*D)
    w_fc_folded = w_fc * scale[:, None]
    b_fc_folded = (beta - mean * scale).astype(np.float32)
    d_fc = w_fc.shape[0]
    C = w_fc.shape[1] // D

    # Scatter into the padded-lane layout: row c*128+k of w_fc_pad corresponds
    # to lane k of zdes for channel c (zero for k >= D).
    w_fc_pad = np.zeros((C, d_pad, d_fc), np.float32)
    w_fc_pad[:, :D, :] = w_fc_folded.T.reshape(C, D, d_fc)
    w_fc_pad = w_fc_pad.reshape(C * d_pad, d_fc)

    return {
        "p_des": jnp.asarray(p_des_pad, dtype=jnp.bfloat16),   # (HW, 128) bf16
        "b_des": jnp.asarray(b_des_pad),                       # (1, 128)  f32
        "w_fc_pad": jnp.asarray(w_fc_pad),                     # (C*128, d)
        "b_fc": jnp.asarray(b_fc_folded[None, :]),             # (1, d)
        "w_fx_t": jnp.asarray(np.asarray(params["w_fx"], np.float32).T),
        "b_fx": jnp.asarray(np.asarray(params["b_fx"], np.float32)[None, :]),
        "w_fy_t": jnp.asarray(np.asarray(params["w_fy"], np.float32).T),
        "b_fy": jnp.asarray(np.asarray(params["b_fy"], np.float32)[None, :]),
    }


# ----------------------------------------------------------------------------
# Tile sizing — generation-aware VMEM budget, >= _MIN_GRID_STEPS grid steps.
# ----------------------------------------------------------------------------
_MIN_GRID_STEPS = 4   # >=2 for DMA/compute overlap, >=2 for v7x megacore split


def _vmem_budget():
    """(target, vmem_limit) derived from the actual chip's VMEM capacity
    (v5e/v6e: 128 MiB, v7x: 64 MiB per TensorCore)."""
    cap = 64 * 1024 * 1024                      # conservative fallback (v7x)
    try:
        cap = int(getattr(pltpu.get_tpu_info(), "vmem_capacity_bytes", cap))
    except Exception:
        pass
    return int(cap * 0.70), int(cap * 0.85)


def _choose_tm(bc, hw, d_pad, x_bytes, vmem_target):
    # Pallas double-buffers even constant-index blocks -> account the resident
    # descriptor weights at 2x (bf16 halves their footprint).
    resident_k1 = 2 * hw * d_pad * 2 + 2 * d_pad * 4
    per_row_k1 = 2 * 2 * hw * x_bytes + 2 * d_pad * 2    # x,y dbl-buffered + bf16 zdes
    per_row_k3 = 3 * 2 * hw * x_bytes + 2 * 4            # x,y,out dbl-buffered + wx
    # TODO(synk): for very large H*W on v7x, chunk the hw axis with a second
    # "arbitrary" grid dim + f32 VMEM accumulator instead of a fully-resident P_des.
    avail_k1 = max(vmem_target - resident_k1, 8 * per_row_k1)
    tm = min(avail_k1 // per_row_k1, vmem_target // per_row_k3, 2048)
    # Keep at least _MIN_GRID_STEPS grid steps so double-buffering overlaps and
    # v7x can shard the row loop across both TensorCores.
    tm = min(tm, _round_up(-(-bc // _MIN_GRID_STEPS), 8))
    tm = max(8, (tm // 8) * 8)
    if tm > bc:
        tm = bc          # whole-axis block (full-dim blocks are always legal)
    return tm


def _full_spec(shape):
    # whole-array block (block == full array dims satisfies the (8,128) rule)
    return pl.BlockSpec(shape, lambda *_: (0,) * len(shape))


# ----------------------------------------------------------------------------
# Forward pass
# ----------------------------------------------------------------------------
@jax.jit
def psk_forward(x, y, fp):
    B, C, H, W = x.shape
    BC, HW = B * C, H * W

    p_des = fp["p_des"]                    # (HW, 128) bf16
    d_pad = p_des.shape[1]
    d_fc = fp["w_fc_pad"].shape[1]

    vmem_target, vmem_limit = _vmem_budget()
    tm = _choose_tm(BC, HW, d_pad, x.dtype.itemsize, vmem_target)
    grid = (pl.cdiv(BC, tm),)

    cp = pltpu.CompilerParams(
        dimension_semantics=("parallel",),   # v7x: shard the BC loop across 2 TCs
        vmem_limit_bytes=vmem_limit,
    )

    # Free, contiguous reshapes — NO jnp.pad and NO output slice anywhere:
    # the lane dim uses the full HW width, and the ragged BC tail is handled by
    # Pallas' masked edge blocks (garbage rows never reach HBM).
    x_flat = x.reshape(BC, HW)
    y_flat = y.reshape(BC, HW)

    # --- kernel 1: (x+y) @ P_des + b  (pool pyramid + descriptor conv fused) --
    zdes = pl.pallas_call(
        pool_des_kernel,
        out_shape=jax.ShapeDtypeStruct((BC, d_pad), jnp.bfloat16),
        grid=grid,
        in_specs=[
            pl.BlockSpec((tm, HW), lambda i: (i, 0)),
            pl.BlockSpec((tm, HW), lambda i: (i, 0)),
            pl.BlockSpec((HW, d_pad), lambda i: (0, 0)),   # resident weights
            pl.BlockSpec((1, d_pad), lambda i: (0, 0)),    # resident bias
        ],
        out_specs=pl.BlockSpec((tm, d_pad), lambda i: (i, 0)),
        compiler_params=cp,
    )(x_flat, y_flat, p_des, fp["b_des"])

    # free reshape: (B*C, 128) -> (B, C*128); the lane padding is already folded
    # (as zero rows) into w_fc_pad, so no slice/copy of zdes is needed.
    z2 = zdes.reshape(B, C * d_pad)

    # --- kernel 2: fc(+folded BN) -> ReLU -> fc_x/fc_y -> branch softmax ------
    w_x = pl.pallas_call(
        fc_act_kernel,
        out_shape=jax.ShapeDtypeStruct((B, C), jnp.float32),
        grid=(1,),
        in_specs=[
            _full_spec((B, C * d_pad)),
            _full_spec((C * d_pad, d_fc)),
            _full_spec((1, d_fc)),
            _full_spec((d_fc, C)),
            _full_spec((1, C)),
            _full_spec((d_fc, C)),
            _full_spec((1, C)),
        ],
        out_specs=_full_spec((B, C)),
        compiler_params=cp,
    )(z2, fp["w_fc_pad"], fp["b_fc"], fp["w_fx_t"], fp["b_fx"],
      fp["w_fy_t"], fp["b_fy"])

    wx_col = w_x.reshape(BC, 1)            # free reshape, no pad (w_y = 1 - w_x)

    # --- kernel 3: out = y + w_x * (x - y)  (broadcast over spatial) ----------
    out_flat = pl.pallas_call(
        apply_kernel,
        out_shape=jax.ShapeDtypeStruct((BC, HW), x.dtype),
        grid=grid,
        in_specs=[
            pl.BlockSpec((tm, HW), lambda i: (i, 0)),
            pl.BlockSpec((tm, HW), lambda i: (i, 0)),
            pl.BlockSpec((tm, 1), lambda i: (i, 0)),
        ],
        out_specs=pl.BlockSpec((tm, HW), lambda i: (i, 0)),
        compiler_params=cp,
    )(x_flat, y_flat, wx_col)

    return out_flat.reshape(B, C, H, W)


# ----------------------------------------------------------------------------
# Pure-JAX reference (uses the un-folded parameters) for correctness check
# ----------------------------------------------------------------------------
def psk_reference(x, y, params):
    B, C, H, W = x.shape
    D = params["w_des"].shape[0]
    U = x + y
    z = U.reshape(B * C, H * W) @ params["pool"]                   # (BC, F)
    zd = z @ params["w_des"].T + params["b_des"]                   # (BC, D)
    z2 = zd.reshape(B, C * D)
    z1 = z2 @ params["w_fc"].T
    zbn = (z1 - params["bn_mean"]) / jnp.sqrt(params["bn_var"] + 1e-5)
    zbn = zbn * params["bn_gamma"] + params["bn_beta"]
    zf = jnp.maximum(zbn, 0.0)
    zx = zf @ params["w_fx"].T + params["b_fx"]
    zy = zf @ params["w_fy"].T + params["b_fy"]
    wxy = jax.nn.softmax(jnp.stack([zx, zy], axis=1), axis=1)
    w_x, w_y = wxy[:, 0], wxy[:, 1]
    return x * w_x[:, :, None, None] + y * w_y[:, :, None, None]


if __name__ == "__main__":
    B, C, H, W = 2, 4, 16, 16   # in_ch=4, ppl=4 -> feats=85, descriptor=8, d=16
    key = jax.random.PRNGKey(0)
    kx, ky, kp = jax.random.split(key, 3)
    x = jax.random.normal(kx, (B, C, H, W), jnp.float32)
    y = jax.random.normal(ky, (B, C, H, W), jnp.float32)

    raw_params = init_params(kp, C, H, W)
    folded = fold_params(raw_params, H, W)

    out = psk_forward(x, y, folded)
    jax.block_until_ready(out)

    ref = psk_reference(x, y, raw_params)
    np.testing.assert_allclose(np.asarray(out, np.float32), np.asarray(ref),
                               rtol=1e-2, atol=1e-2)
    print("KERNEL_OK")
</pallas_src>

<mosaic_0001>
module attributes {stable_mosaic.version = 11 : i64} {
  func.func @pool_des_kernel(%arg0: i32, %arg1: memref<8x256xf32, #tpu.memory_space<vmem>>, %arg2: memref<8x256xf32, #tpu.memory_space<vmem>>, %arg3: memref<256x128xbf16, #tpu.memory_space<vmem>>, %arg4: memref<1x128xf32, #tpu.memory_space<vmem>>, %arg5: memref<8x128xbf16, #tpu.memory_space<vmem>>) attributes {dimension_semantics = [#tpu.dimension_semantics<parallel>], iteration_bounds = array<i64: 1>, scalar_prefetch = 0 : i64, scratch_operands = 0 : i64, tpu.core_type = #tpu.core_type<tc>, window_params = [{transform_indices = @transform_0, window_bounds = array<i64: 8, 256>}, {transform_indices = @transform_1, window_bounds = array<i64: 8, 256>}, {pipeline_mode = #tpu.pipeline_mode<synchronous>, transform_indices = @transform_2, window_bounds = array<i64: 256, 128>}, {pipeline_mode = #tpu.pipeline_mode<synchronous>, transform_indices = @transform_3, window_bounds = array<i64: 1, 128>}, {transform_indices = @transform_4, window_bounds = array<i64: 8, 128>}]} {
    %c0 = arith.constant 0 : index
    %c0_0 = arith.constant 0 : index
    %0 = vector.load %arg1[%c0, %c0_0] : memref<8x256xf32, #tpu.memory_space<vmem>>, vector<8x256xf32>
    %c0_1 = arith.constant 0 : index
    %c0_2 = arith.constant 0 : index
    %1 = vector.load %arg2[%c0_1, %c0_2] : memref<8x256xf32, #tpu.memory_space<vmem>>, vector<8x256xf32>
    %2 = arith.addf %0, %1 : vector<8x256xf32>
    %3 = arith.truncf %2 : vector<8x256xf32> to vector<8x256xbf16>
    %c0_3 = arith.constant 0 : index
    %c0_4 = arith.constant 0 : index
    %4 = vector.load %arg3[%c0_3, %c0_4] : memref<256x128xbf16, #tpu.memory_space<vmem>>, vector<256x128xbf16>
    %cst = arith.constant dense<0.000000e+00> : vector<8x128xf32>
    %5 = tpu.matmul %3, %4, %cst {dimension_numbers = #tpu.dot_dimension_numbers<[1], [0], [0], [1], [0, 0, 1, 1], [], []>} : vector<8x256xbf16>, vector<256x128xbf16>, vector<8x128xf32> -> vector<8x128xf32>
    %c0_5 = arith.constant 0 : index
    %c0_6 = arith.constant 0 : index
    %6 = vector.load %arg4[%c0_5, %c0_6] : memref<1x128xf32, #tpu.memory_space<vmem>>, vector<1x128xf32>
    %7 = vector.broadcast %6 : vector<1x128xf32> to vector<8x128xf32>
    %8 = arith.addf %5, %7 : vector<8x128xf32>
    %9 = arith.truncf %8 : vector<8x128xf32> to vector<8x128xbf16>
    %c0_7 = arith.constant 0 : index
    %c0_8 = arith.constant 0 : index
    %10 = vector.load %arg5[%c0_7, %c0_8] : memref<8x128xbf16, #tpu.memory_space<vmem>>, vector<8x128xbf16>
    tpu.vector_store %arg5[%c0_7, %c0_8], %9 {strides = array<i32>} : memref<8x128xbf16, #tpu.memory_space<vmem>>, vector<8x128xbf16>,
    return
  }
  func.func @transform_0(%arg0: i32) -> (i32, i32) {
    %c0_i32 = arith.constant 0 : i32
    %c0_i32_0 = arith.constant 0 : i32
    return %arg0, %c0_i32 : i32, i32
  }
  func.func @transform_1(%arg0: i32) -> (i32, i32) {
    %c0_i32 = arith.constant 0 : i32
    %c0_i32_0 = arith.constant 0 : i32
    return %arg0, %c0_i32 : i32, i32
  }
  func.func @transform_2(%arg0: i32) -> (i32, i32) {
    %c0_i32 = arith.constant 0 : i32
    %c0_i32_0 = arith.constant 0 : i32
    %c0_i32_1 = arith.constant 0 : i32
    return %c0_i32, %c0_i32_0 : i32, i32
  }
  func.func @transform_3(%arg0: i32) -> (i32, i32) {
    %c0_i32 = arith.constant 0 : i32
    %c0_i32_0 = arith.constant 0 : i32
    %c0_i32_1 = arith.constant 0 : i32
    return %c0_i32, %c0_i32_0 : i32, i32
  }
  func.func @transform_4(%arg0: i32) -> (i32, i32) {
    %c0_i32 = arith.constant 0 : i32
    %c0_i32_0 = arith.constant 0 : i32
    return %arg0, %c0_i32 : i32, i32
  }
}

module attributes {stable_mosaic.version = 11 : i64} {
  func.func @apply_kernel(%arg0: i32, %arg1: memref<8x256xf32, #tpu.memory_space<vmem>>, %arg2: memref<8x256xf32, #tpu.memory_space<vmem>>, %arg3: memref<8x1xf32, #tpu.memory_space<vmem>>, %arg4: memref<8x256xf32, #tpu.memory_space<vmem>>) attributes {dimension_semantics = [#tpu.dimension_semantics<parallel>], iteration_bounds = array<i64: 1>, scalar_prefetch = 0 : i64, scratch_operands = 0 : i64, tpu.core_type = #tpu.core_type<tc>, window_params = [{transform_indices = @transform_0, window_bounds = array<i64: 8, 256>}, {transform_indices = @transform_1, window_bounds = array<i64: 8, 256>}, {transform_indices = @transform_2, window_bounds = array<i64: 8, 1>}, {transform_indices = @transform_3, window_bounds = array<i64: 8, 256>}]} {
    %c0 = arith.constant 0 : index
    %c0_0 = arith.constant 0 : index
    %0 = vector.load %arg1[%c0, %c0_0] : memref<8x256xf32, #tpu.memory_space<vmem>>, vector<8x256xf32>
    %c0_1 = arith.constant 0 : index
    %c0_2 = arith.constant 0 : index
    %1 = vector.load %arg2[%c0_1, %c0_2] : memref<8x256xf32, #tpu.memory_space<vmem>>, vector<8x256xf32>
    %c0_3 = arith.constant 0 : index
    %c0_4 = arith.constant 0 : index
    %2 = vector.load %arg3[%c0_3, %c0_4] : memref<8x1xf32, #tpu.memory_space<vmem>>, vector<8x1xf32>
    %3 = arith.subf %0, %1 : vector<8x256xf32>
    %4 = vector.broadcast %2 : vector<8x1xf32> to vector<8x256xf32>
    %5 = arith.mulf %4, %3 : vector<8x256xf32>
    %6 = arith.addf %1, %5 : vector<8x256xf32>
    %c0_5 = arith.constant 0 : index
    %c0_6 = arith.constant 0 : index
    %7 = vector.load %arg4[%c0_5, %c0_6] : memref<8x256xf32, #tpu.memory_space<vmem>>, vector<8x256xf32>
    tpu.vector_store %arg4[%c0_5, %c0_6], %6 {strides = array<i32>} : memref<8x256xf32, #tpu.memory_space<vmem>>, vector<8x256xf32>,
    return
  }
  func.func @transform_0(%arg0: i32) -> (i32, i32) {
    %c0_i32 = arith.constant 0 : i32
    %c0_i32_0 = arith.constant 0 : i32
    return %arg0, %c0_i32 : i32, i32
  }
  func.func @transform_1(%arg0: i32) -> (i32, i32) {
    %c0_i32 = arith.constant 0 : i32
    %c0_i32_0 = arith.constant 0 : i32
    return %arg0, %c0_i32 : i32, i32
  }
  func.func @transform_2(%arg0: i32) -> (i32, i32) {
    %c0_i32 = arith.constant 0 : i32
    %c0_i32_0 = arith.constant 0 : i32
    return %arg0, %c0_i32 : i32, i32
  }
  func.func @transform_3(%arg0: i32) -> (i32, i32) {
    %c0_i32 = arith.constant 0 : i32
    %c0_i32_0 = arith.constant 0 : i32
    return %arg0, %c0_i32 : i32, i32
  }
}

module attributes {stable_mosaic.version = 11 : i64} {
  func.func @fc_act_kernel(%arg0: i32, %arg1: memref<2x512xbf16, #tpu.memory_space<vmem>>, %arg2: memref<512x16xf32, #tpu.memory_space<vmem>>, %arg3: memref<1x16xf32, #tpu.memory_space<vmem>>, %arg4: memref<16x4xf32, #tpu.memory_space<vmem>>, %arg5: memref<1x4xf32, #tpu.memory_space<vmem>>, %arg6: memref<16x4xf32, #tpu.memory_space<vmem>>, %arg7: memref<1x4xf32, #tpu.memory_space<vmem>>, %arg8: memref<2x4xf32, #tpu.memory_space<vmem>>) attributes {dimension_semantics = [#tpu.dimension_semantics<parallel>], iteration_bounds = array<i64: 1>, scalar_prefetch = 0 : i64, scratch_operands = 0 : i64, tpu.core_type = #tpu.core_type<tc>, window_params = [{pipeline_mode = #tpu.pipeline_mode<synchronous>, transform_indices = @transform_0, window_bounds = array<i64: 2, 512>}, {pipeline_mode = #tpu.pipeline_mode<synchronous>, transform_indices = @transform_1, window_bounds = array<i64: 512, 16>}, {pipeline_mode = #tpu.pipeline_mode<synchronous>, transform_indices = @transform_2, window_bounds = array<i64: 1, 16>}, {pipeline_mode = #tpu.pipeline_mode<synchronous>, transform_indices = @transform_3, window_bounds = array<i64: 16, 4>}, {pipeline_mode = #tpu.pipeline_mode<synchronous>, transform_indices = @transform_4, window_bounds = array<i64: 1, 4>}, {pipeline_mode = #tpu.pipeline_mode<synchronous>, transform_indices = @transform_5, window_bounds = array<i64: 16, 4>}, {pipeline_mode = #tpu.pipeline_mode<synchronous>, transform_indices = @transform_6, window_bounds = array<i64: 1, 4>}, {pipeline_mode = #tpu.pipeline_mode<synchronous>, transform_indices = @transform_7, window_bounds = array<i64: 2, 4>}]} {
    %c0 = arith.constant 0 : index
    %c0_0 = arith.constant 0 : index
    %0 = vector.load %arg1[%c0, %c0_0] : memref<2x512xbf16, #tpu.memory_space<vmem>>, vector<2x512xbf16>
    %1 = arith.extf %0 : vector<2x512xbf16> to vector<2x512xf32>
    %c0_1 = arith.constant 0 : index
    %c0_2 = arith.constant 0 : index
    %2 = vector.load %arg2[%c0_1, %c0_2] : memref<512x16xf32, #tpu.memory_space<vmem>>, vector<512x16xf32>
    %cst = arith.constant dense<0.000000e+00> : vector<2x16xf32>
    %3 = tpu.matmul %1, %2, %cst {dimension_numbers = #tpu.dot_dimension_numbers<[1], [0], [0], [1], [0, 0, 1, 1], [], []>} : vector<2x512xf32>, vector<512x16xf32>, vector<2x16xf32> -> vector<2x16xf32>
    %c0_3 = arith.constant 0 : index
    %c0_4 = arith.constant 0 : index
    %4 = vector.load %arg3[%c0_3, %c0_4] : memref<1x16xf32, #tpu.memory_space<vmem>>, vector<1x16xf32>
    %5 = vector.broadcast %4 : vector<1x16xf32> to vector<2x16xf32>
    %6 = arith.addf %3, %5 : vector<2x16xf32>
    %cst_5 = arith.constant 0.000000e+00 : f32
    %7 = vector.broadcast %cst_5 : f32 to vector<2x16xf32>
    %8 = arith.maximumf %6, %7 : vector<2x16xf32>
    %c0_6 = arith.constant 0 : index
    %c0_7 = arith.constant 0 : index
    %9 = vector.load %arg4[%c0_6, %c0_7] : memref<16x4xf32, #tpu.memory_space<vmem>>, vector<16x4xf32>
    %cst_8 = arith.constant dense<0.000000e+00> : vector<2x4xf32>
    %10 = tpu.matmul %8, %9, %cst_8 {dimension_numbers = #tpu.dot_dimension_numbers<[1], [0], [0], [1], [0, 0, 1, 1], [], []>} : vector<2x16xf32>, vector<16x4xf32>, vector<2x4xf32> -> vector<2x4xf32>
    %c0_9 = arith.constant 0 : index
    %c0_10 = arith.constant 0 : index
    %11 = vector.load %arg5[%c0_9, %c0_10] : memref<1x4xf32, #tpu.memory_space<vmem>>, vector<1x4xf32>
    %12 = vector.broadcast %11 : vector<1x4xf32> to vector<2x4xf32>
    %13 = arith.addf %10, %12 : vector<2x4xf32>
    %c0_11 = arith.constant 0 : index
    %c0_12 = arith.constant 0 : index
    %14 = vector.load %arg6[%c0_11, %c0_12] : memref<16x4xf32, #tpu.memory_space<vmem>>, vector<16x4xf32>
    %cst_13 = arith.constant dense<0.000000e+00> : vector<2x4xf32>
    %15 = tpu.matmul %8, %14, %cst_13 {dimension_numbers = #tpu.dot_dimension_numbers<[1], [0], [0], [1], [0, 0, 1, 1], [], []>} : vector<2x16xf32>, vector<16x4xf32>, vector<2x4xf32> -> vector<2x4xf32>
    %c0_14 = arith.constant 0 : index
    %c0_15 = arith.constant 0 : index
    %16 = vector.load %arg7[%c0_14, %c0_15] : memref<1x4xf32, #tpu.memory_space<vmem>>, vector<1x4xf32>
    %17 = vector.broadcast %16 : vector<1x4xf32> to vector<2x4xf32>
    %18 = arith.addf %15, %17 : vector<2x4xf32>
    %19 = arith.subf %18, %13 : vector<2x4xf32>
    %20 = math.exp %19 : vector<2x4xf32>
    %cst_16 = arith.constant 1.000000e+00 : f32
    %21 = vector.broadcast %cst_16 : f32 to vector<2x4xf32>
    %22 = arith.addf %21, %20 : vector<2x4xf32>
    %cst_17 = arith.constant 1.000000e+00 : f32
    %23 = vector.broadcast %cst_17 : f32 to vector<2x4xf32>
    %24 = arith.divf %23, %22 : vector<2x4xf32>
    %c0_18 = arith.constant 0 : index
    %c0_19 = arith.constant 0 : index
    %25 = vector.load %arg8[%c0_18, %c0_19] : memref<2x4xf32, #tpu.memory_space<vmem>>, vector<2x4xf32>
    tpu.vector_store %arg8[%c0_18, %c0_19], %24 {strides = array<i32>} : memref<2x4xf32, #tpu.memory_space<vmem>>, vector<2x4xf32>,
    return
  }
  func.func @transform_0(%arg0: i32) -> (i32, i32) {
    %c0_i32 = arith.constant 0 : i32
    %c0_i32_0 = arith.constant 0 : i32
    %c0_i32_1 = arith.constant 0 : i32
    return %c0_i32, %c0_i32_0 : i32, i32
  }
  func.func @transform_1(%arg0: i32) -> (i32, i32) {
    %c0_i32 = arith.constant 0 : i32
    %c0_i32_0 = arith.constant 0 : i32
    %c0_i32_1 = arith.constant 0 : i32
    return %c0_i32, %c0_i32_0 : i32, i32
  }
  func.func @transform_2(%arg0: i32) -> (i32, i32) {
    %c0_i32 = arith.constant 0 : i32
    %c0_i32_0 = arith.constant 0 : i32
    %c0_i32_1 = arith.constant 0 : i32
    return %c0_i32, %c0_i32_0 : i32, i32
  }
  func.func @transform_3(%arg0: i32) -> (i32, i32) {
    %c0_i32 = arith.constant 0 : i32
    %c0_i32_0 = arith.constant 0 : i32
    %c0_i32_1 = arith.constant 0 : i32
    return %c0_i32, %c0_i32_0 : i32, i32
  }
  func.func @transform_4(%arg0: i32) -> (i32, i32) {
    %c0_i32 = arith.constant 0 : i32
    %c0_i32_0 = arith.constant 0 : i32
    %c0_i32_1 = arith.constant 0 : i32
    return %c0_i32, %c0_i32_0 : i32, i32
  }
  func.func @transform_5(%arg0: i32) -> (i32, i32) {
    %c0_i32 = arith.constant 0 : i32
    %c0_i32_0 = arith.constant 0 : i32
    %c0_i32_1 = arith.constant 0 : i32
    return %c0_i32, %c0_i32_0 : i32, i32
  }
  func.func @transform_6(%arg0: i32) -> (i32, i32) {
    %c0_i32 = arith.constant 0 : i32
    %c0_i32_0 = arith.constant 0 : i32
    %c0_i32_1 = arith.constant 0 : i32
    return %c0_i32, %c0_i32_0 : i32, i32
  }
  func.func @transform_7(%arg0: i32) -> (i32, i32) {
    %c0_i32 = arith.constant 0 : i32
    %c0_i32_0 = arith.constant 0 : i32
    %c0_i32_1 = arith.constant 0 : i32
    return %c0_i32, %c0_i32_0 : i32, i32
  }
}

</mosaic_0001>

<bundles_post_ra>
// kernel: psk_forward.5
= control target key start
LH: loop header
LB: loop body
LE: loop exit
PB: predicated region body
PF: predicated region fallthrough
CT: control target
= control target key end

     0   :  { %v38_v0 = vmov 0   ;;  %s80_s2 = inlined_call_operand.vmem [shape: f32[8,1], index: 2, kind: input, shape index: {}]   ;;  %s81_s0 = inlined_call_operand.vmem [shape: f32[8,256], index: 0, kind: input, shape index: {}]   ;;  %s82_s1 = inlined_call_operand.vmem [shape: f32[8,256], index: 1, kind: input, shape index: {}]   ;;  %s83_s3 = inlined_call_operand.vmem [shape: f32[8,256], index: 3, kind: output, shape index: {}]  }
   0x1   :  { %37 = vset.pattern.permute.xlu0 %v38_v0  ;;  %v18_v1 = vld [vmem:[%s80_s2] sm:$0xff]  ;;  %v15_v3 = vld [vmem:[%s81_s0 + $0x8] sm:$0xff] }
   0x2   :  { %23 = vperm.xlu0 %37, %v18_v1   ;;  %v14_v2 = vld [vmem:[%s81_s0] sm:$0xff]  ;;  %v17_v5 = vld [vmem:[%s82_s1 + $0x8] sm:$0xff] }
   0x3   :  { %v16_v4 = vld [vmem:[%s82_s1] sm:$0xff]  ;;  %v20_v7 = vsub.f32 %v15_v3, %v17_v5 }
   0x4   :  { %v19_v6 = vsub.f32 %v14_v2, %v16_v4 }
  0x74   :  { %v24_v8 = vpop.permute.xlu0 %23 }
  0x75   :  { %v26_v9 = vmul.f32 %v24_v8, %v19_v6  ;;  %v27_v10 = vmul.f32 %v24_v8, %v20_v7 }
  0x77   :  { %v28_v11 = vadd.f32 %v26_v9, %v16_v4  ;;  %v29_v12 = vadd.f32 %v27_v10, %v17_v5 }
  0x79   :  { %30 = vst [vmem:[%s83_s3] sm:$0xff] %v28_v11 }
  0x7a   :  { %31 = vst [vmem:[%s83_s3 + $0x8] sm:$0xff] %v29_v12 }

// kernel: psk_forward.3
= control target key start
LH: loop header
LB: loop body
LE: loop exit
PB: predicated region body
PF: predicated region fallthrough
CT: control target
= control target key end

     0   :  { %9 = vsyncpa [#allocation3], 0  ;;  %s316_s18 = smov [#allocation2]   ;;  %s317_s20 = smov 64   ;;  %s365_s0 = inlined_call_operand.vmem [shape: f32[8,256], index: 0, kind: input, shape index: {}]   ;;  %s366_s1 = inlined_call_operand.vmem [shape: f32[8,256], index: 1, kind: input, shape index: {}]   ;;  %s367_s2 = inlined_call_operand.hbm [shape: bf16[256,128], index: 2, kind: input, shape index: {}]   ;;  %s368_s3 = inlined_call_operand.vmem [shape: f32[1,128], index: 3, kind: input, shape index: {}]   ;;  %s369_s4 = inlined_call_operand.vmem [shape: bf16[8,128], index: 4, kind: output, shape index: {}]  }
   0x1   :  { %s18_s17 = sshll.u32 %s367_s2, 4  ;;  %s20_s19 = sshll.u32 %s316_s18, 4  ;;  %s19_s17 = int_to_ptr.hbm [resolvable:$true] %s18_s17  ;;  %s21_s19 = int_to_ptr.vmem [resolvable:$true] %s20_s19 }
   0x2   :  { %s318_s21 = smov 4  }
   0x3   :  { %26 = dma.hbm_to_vmem [thread:$0]  %s19_s17, 2048, %s21_s19, [#allocation3], %s317_s20, %s317_s20, %s318_s21  }
   0x4   :  { %314 = dma.done.wait [#allocation3], 2048  }
   0x5   :  { %315 = vsyncadd [#allocation3], 4294965248  ;;  %v277_v0 = vld [vmem:[#allocation2 + $0x38] sm:$0xff]  ;;  %v276_v2 = vld [vmem:[#allocation2 + $0x30] sm:$0xff] }
   0x6   :  { %v285_v1 = vld [vmem:[#allocation2 + $0x78] sm:$0xff]  ;;  %173 = vmatpush.bf16.msra.mxu0 %v277_v0  ;;  %v284_v3 = vld [vmem:[#allocation2 + $0x70] sm:$0xff]  ;;  %v275_v4 = vld [vmem:[#allocation2 + $0x28] sm:$0xff] }
   0x7   :  { %186 = vmatpush.bf16.msra.mxu1 %v285_v1  ;;  %v283_v5 = vld [vmem:[#allocation2 + $0x68] sm:$0xff]  ;;  %v274_v6 = vld [vmem:[#allocation2 + $0x20] sm:$0xff]  ;;  %v273_v8 = vld [vmem:[#allocation2 + $0x18] sm:$0xff] }
   0x8   :  { %v282_v7 = vld [vmem:[#allocation2 + $0x60] sm:$0xff]  ;;  %v281_v9 = vld [vmem:[#allocation2 + $0x58] sm:$0xff]  ;;  %v272_v10 = vld [vmem:[#allocation2 + $0x10] sm:$0xff] }
   0x9   :  { %v280_v11 = vld [vmem:[#allocation2 + $0x50] sm:$0xff]  ;;  %v271_v12 = vld [vmem:[#allocation2 + $0x8] sm:$0xff]  ;;  %v33_v14 = vld [vmem:[%s365_s0] sm:$0xff] }
   0xa   :  { %174 = vmatpush.bf16.msra.mxu0 %v276_v2  ;;  %v279_v13 = vld [vmem:[#allocation2 + $0x48] sm:$0xff]  ;;  %v35_v15 = vld [vmem:[%s366_s1] sm:$0xff] }
   0xb   :  { %187 = vmatpush.bf16.msra.mxu1 %v284_v3  ;;  %v34_v16 = vld [vmem:[%s365_s0 + $0x8] sm:$0xff]  ;;  %v37_v18 = vadd.f32 %v35_v15, %v33_v14  ;;  %v270_v20 = vld [vmem:[#allocation2] sm:$0xff] }
   0xc   :  { %v36_v17 = vld [vmem:[%s366_s1 + $0x8] sm:$0xff]  ;;  %v278_v21 = vld [vmem:[#allocation2 + $0x40] sm:$0xff] }
   0xd   :  { %v38_v19 = vadd.f32 %v36_v17, %v34_v16  ;;  %v39_v22 = vpack.c.bf16 %v37_v18, %v37_v18  ;;  %v289_v24 = vld [vmem:[%s368_s3] ss:$0 sm:$0xff] }
   0xe   :  { %175 = vmatpush.bf16.msra.mxu0 %v275_v4 }
   0xf   :  { %188 = vmatpush.bf16.msra.mxu1 %v283_v5  ;;  %v40_v23 = vpack.c.bf16 %v38_v19, %v38_v19 }
  0x12   :  { %176 = vmatpush.bf16.msra.mxu0 %v274_v6 }
  0x13   :  { %189 = vmatpush.bf16.msra.mxu1 %v282_v7 }
  0x16   :  { %177 = vmatpush.bf16.msra.mxu0 %v273_v8 }
  0x17   :  { %190 = vmatpush.bf16.msra.mxu1 %v281_v9 }
  0x1a   :  { %178 = vmatpush.bf16.msra.mxu0 %v272_v10 }
  0x1b   :  { %191 = vmatpush.bf16.msra.mxu1 %v280_v11 }
  0x1e   :  { %179 = vmatpush.bf16.msra.mxu0 %v271_v12 }
  0x1f   :  { %192 = vmatpush.bf16.msra.mxu1 %v279_v13 }
  0x22   :  { %180 = vmatpush.bf16.msra.mxu0 %v270_v20 }
  0x23   :  { %193 = vmatpush.bf16.msra.mxu1 %v278_v21 }
  0x25   :  { %181 = vmatmul.bf16.vlgmr.msra.gmra.mxu0 %v39_v22 }
  0x26   :  { %194 = vmatmul.bf16.vlgmr.msra.gmra.mxu1 %v40_v23 }
  0xa2   :  { %v182_v25 = vpop.f32.mrf.mxu0 }
  0xa3   :  { %v195_v26 = vpop.f32.mrf.mxu1  ;;  %v183_v27 = vadd.f32 %v289_v24, %v182_v25 }
  0xa5   :  { %v196_v28 = vadd.f32 %v195_v26, %v183_v27 }
  0xa7   :  { %v199_v29 = vpack.c.bf16 %v196_v28, %v196_v28 }
  0xa9   :  { %200 = vst [vmem:[%s369_s4] sm:$0xf] %v199_v29 }
  0xaa   :  { %v184_v30 = vpop.f32.mrf.mxu0 }
  0xab   :  { %v197_v31 = vpop.f32.mrf.mxu1 }
  0xac   :  { %205 = vsyncpa [#allocation3], 1 }

// kernel: psk_forward.4
= control target key start
LH: loop header
LB: loop body
LE: loop exit
PB: predicated region body
PF: predicated region fallthrough
CT: control target
= control target key end

     0   :  { %vm193_vm0 = vcmask 130048   ;;  %vm262_vm4 = vcmask 25600   ;;  %s536_s1 = inlined_call_operand.vmem [shape: f32[512,16], index: 1, kind: input, shape index: {}]   ;;  %s537_s0 = inlined_call_operand.vmem [shape: bf16[2,512], index: 0, kind: input, shape index: {}]   ;;  %s538_s2 = inlined_call_operand.vmem [shape: f32[1,16], index: 2, kind: input, shape index: {}]   ;;  %s539_s4 = inlined_call_operand.vmem [shape: f32[1,4], index: 4, kind: input, shape index: {}]   ;;  %s540_s3 = inlined_call_operand.vmem [shape: f32[16,4], index: 3, kind: input, shape index: {}]   ;;  %s541_s5 = inlined_call_operand.vmem [shape: f32[16,4], index: 5, kind: input, shape index: {}]   ;;  %s542_s6 = inlined_call_operand.vmem [shape: f32[1,4], index: 6, kind: input, shape index: {}]   ;;  %s543_s7 = inlined_call_operand.vmem [shape: f32[2,4], index: 7, kind: output, shape index: {}]  }
   0x1   :  { %v75_v0 = vld [vmem:[%s536_s1 + $0x178] sm:$0xff]  ;;  %v74_v2 = vld [vmem:[%s536_s1 + $0x170] sm:$0xff]  ;;  %v73_v6 = vld [vmem:[%s536_s1 + $0x168] sm:$0xff] }
   0x2   :  { %v43_v1 = vld [vmem:[%s536_s1 + $0x78] sm:$0xff]  ;;  %146 = vmatpush.msra.mxu2 %v75_v0  ;;  %v42_v4 = vld [vmem:[%s536_s1 + $0x70] sm:$0xff]  ;;  %v41_v8 = vld [vmem:[%s536_s1 + $0x68] sm:$0xff] }
   0x3   :  { %106 = vmatpush.msra.mxu0 %v43_v1  ;;  %v91_v3 = vld [vmem:[%s536_s1 + $0x1f8] sm:$0xff]  ;;  %v90_v7 = vld [vmem:[%s536_s1 + $0x1f0] sm:$0xff]  ;;  %v89_v10 = vld [vmem:[%s536_s1 + $0x1e8] sm:$0xff] }
   0x4   :  { %v59_v5 = vld [vmem:[%s536_s1 + $0xf8] sm:$0xff]  ;;  %166 = vmatpush.msra.mxu3 %v91_v3  ;;  %147 = vmatpush.msra.mxu2 %v74_v2  ;;  %v58_v9 = vld [vmem:[%s536_s1 + $0xf0] sm:$0xff]  ;;  %v72_v11 = vld [vmem:[%s536_s1 + $0x160] sm:$0xff] }
   0x5   :  { %126 = vmatpush.msra.mxu1 %v59_v5  ;;  %107 = vmatpush.msra.mxu0 %v42_v4  ;;  %v40_v12 = vld [vmem:[%s536_s1 + $0x60] sm:$0xff]  ;;  %v57_v13 = vld [vmem:[%s536_s1 + $0xe8] sm:$0xff]  ;;  %v71_v16 = vld [vmem:[%s536_s1 + $0x158] sm:$0xff] }
   0x6   :  { %167 = vmatpush.msra.mxu3 %v90_v7  ;;  %148 = vmatpush.msra.mxu2 %v73_v6  ;;  %v88_v14 = vld [vmem:[%s536_s1 + $0x1e0] sm:$0xff]  ;;  %v39_v17 = vld [vmem:[%s536_s1 + $0x58] sm:$0xff]  ;;  %v70_v20 = vld [vmem:[%s536_s1 + $0x150] sm:$0xff] }
   0x7   :  { %127 = vmatpush.msra.mxu1 %v58_v9  ;;  %108 = vmatpush.msra.mxu0 %v41_v8  ;;  %v56_v15 = vld [vmem:[%s536_s1 + $0xe0] sm:$0xff]  ;;  %v87_v18 = vld [vmem:[%s536_s1 + $0x1d8] sm:$0xff]  ;;  %v38_v21 = vld [vmem:[%s536_s1 + $0x50] sm:$0xff] }
   0x8   :  { %168 = vmatpush.msra.mxu3 %v89_v10  ;;  %149 = vmatpush.msra.mxu2 %v72_v11  ;;  %v55_v19 = vld [vmem:[%s536_s1 + $0xd8] sm:$0xff]  ;;  %v86_v22 = vld [vmem:[%s536_s1 + $0x1d0] sm:$0xff]  ;;  %v69_v24 = vld [vmem:[%s536_s1 + $0x148] sm:$0xff] }
   0x9   :  { %128 = vmatpush.msra.mxu1 %v57_v13  ;;  %109 = vmatpush.msra.mxu0 %v40_v12  ;;  %v54_v23 = vld [vmem:[%s536_s1 + $0xd0] sm:$0xff]  ;;  %v37_v25 = vld [vmem:[%s536_s1 + $0x48] sm:$0xff]  ;;  %v68_v28 = vld [vmem:[%s536_s1 + $0x140] sm:$0xff] }
   0xa   :  { %169 = vmatpush.msra.mxu3 %v88_v14  ;;  %150 = vmatpush.msra.mxu2 %v71_v16  ;;  %v85_v26 = vld [vmem:[%s536_s1 + $0x1c8] sm:$0xff]  ;;  %v36_v29 = vld [vmem:[%s536_s1 + $0x40] sm:$0xff]  ;;  %v67_v32 = vld [vmem:[%s536_s1 + $0x138] sm:$0xff] }
   0xb   :  { %129 = vmatpush.msra.mxu1 %v56_v15  ;;  %110 = vmatpush.msra.mxu0 %v39_v17  ;;  %v53_v27 = vld [vmem:[%s536_s1 + $0xc8] sm:$0xff]  ;;  %v84_v30 = vld [vmem:[%s536_s1 + $0x1c0] sm:$0xff]  ;;  %v35_v33 = vld [vmem:[%s536_s1 + $0x38] sm:$0xff] }
   0xc   :  { %170 = vmatpush.msra.mxu3 %v87_v18  ;;  %151 = vmatpush.msra.mxu2 %v70_v20  ;;  %v52_v31 = vld [vmem:[%s536_s1 + $0xc0] sm:$0xff]  ;;  %v83_v34 = vld [vmem:[%s536_s1 + $0x1b8] sm:$0xff]  ;;  %v66_v36 = vld [vmem:[%s536_s1 + $0x130] sm:$0xff] }
   0xd   :  { %130 = vmatpush.msra.mxu1 %v55_v19  ;;  %111 = vmatpush.msra.mxu0 %v38_v21  ;;  %v51_v35 = vld [vmem:[%s536_s1 + $0xb8] sm:$0xff]  ;;  %v34_v37 = vld [vmem:[%s536_s1 + $0x30] sm:$0xff]  ;;  %v65_v40 = vld [vmem:[%s536_s1 + $0x128] sm:$0xff] }
   0xe   :  { %171 = vmatpush.msra.mxu3 %v86_v22  ;;  %152 = vmatpush.msra.mxu2 %v69_v24  ;;  %v82_v38 = vld [vmem:[%s536_s1 + $0x1b0] sm:$0xff]  ;;  %v33_v41 = vld [vmem:[%s536_s1 + $0x28] sm:$0xff]  ;;  %v64_v44 = vld [vmem:[%s536_s1 + $0x120] sm:$0xff] }
   0xf   :  { %131 = vmatpush.msra.mxu1 %v54_v23  ;;  %112 = vmatpush.msra.mxu0 %v37_v25  ;;  %v50_v39 = vld [vmem:[%s536_s1 + $0xb0] sm:$0xff]  ;;  %v81_v42 = vld [vmem:[%s536_s1 + $0x1a8] sm:$0xff]  ;;  %v32_v45 = vld [vmem:[%s536_s1 + $0x20] sm:$0xff] }
  0x10   :  { %172 = vmatpush.msra.mxu3 %v85_v26  ;;  %153 = vmatpush.msra.mxu2 %v68_v28  ;;  %v49_v43 = vld [vmem:[%s536_s1 + $0xa8] sm:$0xff]  ;;  %v26_v46 = vld [vmem:[%s537_s0] sm:$0xf]  ;;  %v63_v50 = vld [vmem:[%s536_s1 + $0x118] sm:$0xff] }
  0x11   :  { %132 = vmatpush.msra.mxu1 %v53_v27  ;;  %113 = vmatpush.msra.mxu0 %v36_v29  ;;  %v80_v47 = vld [vmem:[%s536_s1 + $0x1a0] sm:$0xff]  ;;  %v27_v49 = vunpack.c.l.bf16 %v26_v46  ;;  %v31_v51 = vld [vmem:[%s536_s1 + $0x18] sm:$0xff]  ;;  %v62_v54 = vld [vmem:[%s536_s1 + $0x110] sm:$0xff] }
  0x12   :  { %173 = vmatpush.msra.mxu3 %v84_v30  ;;  %154 = vmatpush.msra.mxu2 %v67_v32  ;;  %v48_v48 = vld [vmem:[%s536_s1 + $0xa0] sm:$0xff]  ;;  %v79_v52 = vld [vmem:[%s536_s1 + $0x198] sm:$0xff]  ;;  %v30_v55 = vld [vmem:[%s536_s1 + $0x10] sm:$0xff] }
  0x13   :  { %133 = vmatpush.msra.mxu1 %v52_v31  ;;  %114 = vmatpush.msra.mxu0 %v35_v33  ;;  %v47_v53 = vld [vmem:[%s536_s1 + $0x98] sm:$0xff]  ;;  %97 = vst [vmem:[#allocation1] ss:$4 sm:$0xff] %v27_v49  ;;  %v78_v56 = vld [vmem:[%s536_s1 + $0x190] sm:$0xff]  ;;  %v61_v58 = vld [vmem:[%s536_s1 + $0x108] sm:$0xff] }
  0x14   :  { %174 = vmatpush.msra.mxu3 %v83_v34  ;;  %155 = vmatpush.msra.mxu2 %v66_v36  ;;  %v46_v57 = vld [vmem:[%s536_s1 + $0x90] sm:$0xff]  ;;  %v29_v59 = vld [vmem:[%s536_s1 + $0x8] sm:$0xff]  ;;  %v60_v62 = vld [vmem:[%s536_s1 + $0x100] sm:$0xff] }
  0x15   :  { %134 = vmatpush.msra.mxu1 %v51_v35  ;;  %115 = vmatpush.msra.mxu0 %v34_v37  ;;  %v77_v60 = vld [vmem:[%s536_s1 + $0x188] sm:$0xff]  ;;  %v28_v63 = vld [vmem:[%s536_s1] sm:$0xff] }
  0x16   :  { %175 = vmatpush.msra.mxu3 %v82_v38  ;;  %156 = vmatpush.msra.mxu2 %v65_v40  ;;  %v45_v61 = vld [vmem:[%s536_s1 + $0x88] sm:$0xff]  ;;  %v76_v0 = vld [vmem:[%s536_s1 + $0x180] sm:$0xff] }
  0x17   :  { %135 = vmatpush.msra.mxu1 %v50_v39  ;;  %116 = vmatpush.msra.mxu0 %v33_v41  ;;  %v44_v4 = vld [vmem:[%s536_s1 + $0x80] sm:$0xff]  ;;  %v188_v6 = vld [vmem:[%s540_s3 + $0x8] sm:$0xff] }
  0x18   :  { %176 = vmatpush.msra.mxu3 %v81_v42  ;;  %157 = vmatpush.msra.mxu2 %v64_v44  ;;  %v218_v7 = vld [vmem:[%s541_s5 + $0x8] sm:$0xff]  ;;  %v187_v8 = vld [vmem:[%s540_s3] sm:$0xff] }
  0x19   :  { %136 = vmatpush.msra.mxu1 %v49_v43  ;;  %117 = vmatpush.msra.mxu0 %v32_v45  ;;  %v217_v9 = vld [vmem:[%s541_s5] sm:$0xff] }
  0x1a   :  { %177 = vmatpush.msra.mxu3 %v80_v47  ;;  %158 = vmatpush.msra.mxu2 %v63_v50  ;;  %v100_v1 = vld.sshfl [vmem:[#allocation1 + $0x10] sm:$0xff pattern:$0x73625140]  ;;  %v98_v2 = vld.sshfl [vmem:[#allocation1] sm:$0xff pattern:$0x73625140] }
  0x1b   :  { %137 = vmatpush.msra.mxu1 %v48_v48  ;;  %118 = vmatpush.msra.mxu0 %v31_v51  ;;  %v101_v3 = vld.sshfl [vmem:[#allocation1 + $0x18] sm:$0xff pattern:$0x73625140]  ;;  %v99_v5 = vld.sshfl [vmem:[#allocation1 + $0x8] sm:$0xff pattern:$0x73625140] }
  0x1c   :  { %178 = vmatpush.msra.mxu3 %v79_v52  ;;  %159 = vmatpush.msra.mxu2 %v62_v54  ;;  %v270_v10 = vld [vmem:[%s538_s2] ss:$0 sm:$0xff] }
  0x1d   :  { %138 = vmatpush.msra.mxu1 %v47_v53  ;;  %119 = vmatpush.msra.mxu0 %v30_v55  ;;  %v271_v20 = vld [vmem:[%s539_s4] ss:$0 sm:$0xff] }
  0x1e   :  { %179 = vmatpush.msra.mxu3 %v78_v56  ;;  %160 = vmatpush.msra.mxu2 %v61_v58  ;;  %v272_v21 = vld [vmem:[%s542_s6] ss:$0 sm:$0xff] }
  0x1f   :  { %139 = vmatpush.msra.mxu1 %v46_v57  ;;  %120 = vmatpush.msra.mxu0 %v29_v59 }
  0x20   :  { %180 = vmatpush.msra.mxu3 %v77_v60  ;;  %161 = vmatpush.msra.mxu2 %v60_v62 }
  0x21   :  { %140 = vmatpush.msra.mxu1 %v45_v61  ;;  %121 = vmatpush.msra.mxu0 %v28_v63 }
  0x22   :  { %162 = vmatmul.f32.vlgmr.msra.gmra.mxu2 %v100_v1  ;;  %181 = vmatpush.msra.mxu3 %v76_v0 }
  0x23   :  { %122 = vmatmul.f32.vlgmr.msra.gmra.mxu0 %v98_v2  ;;  %182 = vmatmul.f32.vlgmr.msra.gmra.mxu3 %v101_v3 }
  0x24   :  { %141 = vmatpush.msra.mxu1 %v44_v4  ;;  %211 = vmatpush.msrb.mxu0 %v188_v6 }
  0x25   :  { %142 = vmatmul.f32.vlgmr.msra.gmra.mxu1 %v99_v5 }
  0x26   :  { %237 = vmatpush.msrb.mxu1 %v218_v7  ;;  %212 = vmatpush.msrb.mxu0 %v187_v8 }
  0x28   :  { %238 = vmatpush.msrb.mxu1 %v217_v9 }
  0xa0   :  { %v123_v11 = vpop.f32.mrf.mxu0 }
  0xa1   :  { %v124_v12 = vadd.f32 %v270_v10, %v123_v11 }
  0xa2   :  { %v143_v13 = vpop.f32.mrf.mxu1 }
  0xa3   :  { %v144_v14 = vadd.f32 %v143_v13, %v124_v12 }
  0xa5   :  { %v163_v15 = vpop.f32.mrf.mxu2 }
  0xa6   :  { %v164_v16 = vadd.f32 %v163_v15, %v144_v14  ;;  %v183_v17 = vpop.f32.mrf.mxu3 }
  0xa8   :  { %v184_v18 = vadd.f32 %v183_v17, %v164_v16 }
  0xaa   :  { %v186_v19 = vmax.f32 %v184_v18, 0.0 }
  0xac   :  { %268 = vmatmul.msk.f32.vlgmr.msrb.gmra.mxu0 %vm193_vm0, %v186_v19  ;;  %269 = vmatmul.msk.f32.vlgmr.msrb.gmra.mxu1 %vm193_vm0, %v186_v19 }
 0x129   :  { %v214_v22 = vpop.f32.mrf.mxu0  ;;  %v240_v23 = vpop.f32.mrf.mxu1 }
 0x12a   :  { %v215_v24 = vadd.f32 %v271_v20, %v214_v22  ;;  %v241_v25 = vadd.f32 %v272_v21, %v240_v23 }
 0x12c   :  { %v243_v26 = vsub.f32 %v241_v25, %v215_v24 }
 0x12e   :  { %v244_v27 = vmul.f32 1.442695, %v243_v26 }
 0x130   :  { %273 = vpow2.f32 %v244_v27 }
 0x136   :  { %v274_v28 = vpop.eup %273 }
 0x137   :  { %v246_v29 = vadd.f32 1.0, %v274_v28 }
 0x139   :  { %275 = vrcp.f32 %v246_v29  ;;  %v258_v33 = vand.u32 2147483648, %v246_v29  ;;  %v256_v35 = vand.u32 2147483647, %v246_v29  ;;  %vm252_vm2 = vweird.f32 %v246_v29 }
 0x13b   :  { %v259_v37 = vor.u32 1.1754944e-38, %v258_v33  ;;  %vm257_vm5 = vcmp.eq.f32.partialorder %v256_v35, 8.507059e+37 }
 0x13f   :  { %v276_v30 = vpop.eup %275 }
 0x140   :  { %v248_v31 = vmul.f32 %v276_v30, %v246_v29  ;;  %vm253_vm1 = vweird.f32 %v276_v30 }
 0x141   :  { %vm254_vm3 = vmor %vm252_vm2, %vm253_vm1 }
 0x142   :  { %v249_v32 = vsub.f32 1.0, %v248_v31 }
 0x144   :  { %v250_v34 = vmul.f32 %v276_v30, %v249_v32 }
 0x146   :  { %v251_v36 = vadd.f32 %v276_v30, %v250_v34 }
 0x148   :  { %v255_v38 = vsel %vm254_vm3, %v276_v30, %v251_v36 }
 0x149   :  { %v260_v39 = vsel %vm257_vm5, %v259_v37, %v255_v38 }
 0x14a   :  { %263 = vst.msk [vmem:[%s543_s7] sm:$0x3] %vm262_vm4, %v260_v39 }

</bundles_post_ra>
